<compile_context>
chip_gen: v5e
topology: v5e:2x2
jax: 0.10.0
libtpu: 0.0.40
codegen_flags: <defaults>
</compile_context>

<pallas_src>
import functools

import jax
import jax.numpy as jnp
from jax.experimental import pallas as pl
from jax.experimental.pallas import tpu as pltpu


def _round_up(x, m):
    return (x + m - 1) // m * m


def _rnn_fused_kernel(x_ref, xh_ref, hh_ref, hb_ref, o_ref, y_ref,
                      *, seq_len, batch_pad):
    # (1) Hoisted input projection: one lane-dense MXU matmul for every
    #     timestep at once.  xproj[t*Bp + b, :] = x[t, b, :] @ xh + hb
    xproj = (
        jnp.dot(x_ref[...], xh_ref[...], preferred_element_type=jnp.float32)
        + hb_ref[...]
    )  # (T*Bp, Hp)

    hh = hh_ref[...]   # hoist weight loads out of the loop
    o_w = o_ref[...]
    h = jnp.zeros((batch_pad, hh.shape[0]), jnp.float32)

    # (2) Serial recurrence, fully unrolled (T small & static), h kept in
    #     vregs.  Only the (Bp,Hp)@(Hp,Hp) matmul and the ReLU are on the
    #     serial path; the interleaved y_t = h_t @ o matmul + (8,128) store
    #     are independent of the next step's h and overlap with it.
    for t in range(seq_len):
        pre = xproj[t * batch_pad:(t + 1) * batch_pad, :] + jnp.dot(
            h, hh, preferred_element_type=jnp.float32)
        h = jnp.maximum(pre, 0.0)  # ReLU
        y_ref[pl.ds(t * batch_pad, batch_pad), :] = jnp.dot(
            h, o_w, preferred_element_type=jnp.float32).astype(y_ref.dtype)


def pad_simple_rnn_params(xh, hh, hb, o):
    """Pad weights to (8,128)-friendly shapes ONCE (outside the hot path)."""
    input_dim, hid_dim = xh.shape
    output_dim = o.shape[1]
    # NOTE: padding the contraction dim Ip to 128 is off the critical path;
    # the review flags dropping it as a low-priority, measure-first change.
    Ip = _round_up(input_dim, 128)
    Hp = _round_up(hid_dim, 128)
    Op = _round_up(output_dim, 128)

    xh_p = jnp.zeros((Ip, Hp), jnp.float32).at[:input_dim, :hid_dim].set(xh)
    hh_p = jnp.zeros((Hp, Hp), jnp.float32).at[:hid_dim, :hid_dim].set(hh)
    hb_p = jnp.zeros((1, Hp), jnp.float32).at[0, :hid_dim].set(hb)
    o_p = jnp.zeros((Hp, Op), jnp.float32).at[:hid_dim, :output_dim].set(o)
    return xh_p, hh_p, hb_p, o_p


@functools.partial(jax.jit, static_argnames=("output_dim",))
def simple_rnn_forward(x, xh_p, hh_p, hb_p, o_p, output_dim):
    """Training-mode SimpleRNN forward.

    x: (T, B, input_dim) float32, time-major (matches torch's `for xi in x`).
    xh_p/hh_p/hb_p/o_p: pre-padded weights from pad_simple_rnn_params.
    Returns y: (T, B, output_dim) float32 with y[t] = h_t @ o.
    """
    T, B, input_dim = x.shape
    Ip = xh_p.shape[0]
    Hp = hh_p.shape[0]
    Op = o_p.shape[1]
    Bp = _round_up(B, 8)

    # Only per-call prep: pad + flatten x into one lane-dense 2-D slab.
    xp = jnp.zeros((T, Bp, Ip), jnp.float32).at[:, :B, :input_dim].set(
        x.astype(jnp.float32))
    xp = xp.reshape(T * Bp, Ip)

    kernel = functools.partial(_rnn_fused_kernel, seq_len=T, batch_pad=Bp)

    # Everything (a few hundred KiB) fits comfortably in VMEM -> no grid.
    y_pad = pl.pallas_call(
        kernel,
        out_shape=jax.ShapeDtypeStruct((T * Bp, Op), jnp.float32),
        in_specs=[pl.BlockSpec(memory_space=pltpu.MemorySpace.VMEM)] * 5,
        out_specs=pl.BlockSpec(memory_space=pltpu.MemorySpace.VMEM),
    )(xp, xh_p, hh_p, hb_p, o_p)

    return y_pad.reshape(T, Bp, Op)[:, :B, :output_dim]


def simple_rnn_reference(x, xh, hh, hb, o):
    B = x.shape[1]
    hid_dim = xh.shape[1]

    def step(h, xi):
        h = jax.nn.relu(xi @ xh + h @ hh + hb)
        return h, h @ o

    h0 = jnp.zeros((B, hid_dim), jnp.float32)
    _, ys = jax.lax.scan(step, h0, x)
    return ys


if __name__ == "__main__":
    # Module-implied small shapes: seq=8, batch=2, input_dim=20, hid_dim=32,
    # output_dim=20.
    T, B = 8, 2
    input_dim, hid_dim, output_dim = 20, 32, 20

    key = jax.random.PRNGKey(0)
    kx, kxh, khh, ko = jax.random.split(key, 4)

    x = jax.random.normal(kx, (T, B, input_dim), dtype=jnp.float32)
    # torch.normal(0, 0.01, shape) equivalents; hb is zeros per __init__.
    xh = 0.01 * jax.random.normal(kxh, (input_dim, hid_dim), dtype=jnp.float32)
    hh = 0.01 * jax.random.normal(khh, (hid_dim, hid_dim), dtype=jnp.float32)
    hb = jnp.zeros((hid_dim,), dtype=jnp.float32)
    o = 0.01 * jax.random.normal(ko, (hid_dim, output_dim), dtype=jnp.float32)

    # Weight padding happens once here, not per forward call.
    xh_p, hh_p, hb_p, o_p = pad_simple_rnn_params(xh, hh, hb, o)

    y_kernel = jax.block_until_ready(
        simple_rnn_forward(x, xh_p, hh_p, hb_p, o_p, output_dim=output_dim))
    y_ref = jax.block_until_ready(simple_rnn_reference(x, xh, hh, hb, o))

    assert y_kernel.shape == (T, B, output_dim)
    assert jnp.allclose(y_kernel, y_ref, atol=1e-5, rtol=1e-5), (
        "Pallas kernel output does not match reference"
    )

    print("KERNEL_OK")
</pallas_src>

<mosaic_0001>
module attributes {stable_mosaic.version = 11 : i64} {
  func.func @_rnn_fused_kernel(%arg0: memref<64x128xf32, #tpu.memory_space<vmem>>, %arg1: memref<128x128xf32, #tpu.memory_space<vmem>>, %arg2: memref<128x128xf32, #tpu.memory_space<vmem>>, %arg3: memref<1x128xf32, #tpu.memory_space<vmem>>, %arg4: memref<128x128xf32, #tpu.memory_space<vmem>>, %arg5: memref<64x128xf32, #tpu.memory_space<vmem>>) attributes {dimension_semantics = [], scalar_prefetch = 0 : i64, scratch_operands = 0 : i64, tpu.core_type = #tpu.core_type<tc>} {
    %c0 = arith.constant 0 : index
    %c0_0 = arith.constant 0 : index
    %0 = vector.load %arg0[%c0, %c0_0] : memref<64x128xf32, #tpu.memory_space<vmem>>, vector<64x128xf32>
    %c0_1 = arith.constant 0 : index
    %c0_2 = arith.constant 0 : index
    %1 = vector.load %arg1[%c0_1, %c0_2] : memref<128x128xf32, #tpu.memory_space<vmem>>, vector<128x128xf32>
    %cst = arith.constant dense<0.000000e+00> : vector<64x128xf32>
    %2 = tpu.matmul %0, %1, %cst {dimension_numbers = #tpu.dot_dimension_numbers<[1], [0], [0], [1], [0, 0, 1, 1], [], []>} : vector<64x128xf32>, vector<128x128xf32>, vector<64x128xf32> -> vector<64x128xf32>
    %c0_3 = arith.constant 0 : index
    %c0_4 = arith.constant 0 : index
    %3 = vector.load %arg3[%c0_3, %c0_4] : memref<1x128xf32, #tpu.memory_space<vmem>>, vector<1x128xf32>
    %4 = vector.broadcast %3 : vector<1x128xf32> to vector<64x128xf32>
    %5 = arith.addf %2, %4 : vector<64x128xf32>
    %c0_5 = arith.constant 0 : index
    %c0_6 = arith.constant 0 : index
    %6 = vector.load %arg2[%c0_5, %c0_6] : memref<128x128xf32, #tpu.memory_space<vmem>>, vector<128x128xf32>
    %c0_7 = arith.constant 0 : index
    %c0_8 = arith.constant 0 : index
    %7 = vector.load %arg4[%c0_7, %c0_8] : memref<128x128xf32, #tpu.memory_space<vmem>>, vector<128x128xf32>
    %cst_9 = arith.constant 0.000000e+00 : f32
    %8 = vector.broadcast %cst_9 : f32 to vector<8x128xf32>
    %9 = vector.extract_strided_slice %5 {offsets = [0, 0], sizes = [8, 128], strides = [1, 1]} : vector<64x128xf32> to vector<8x128xf32>
    %cst_10 = arith.constant dense<0.000000e+00> : vector<8x128xf32>
    %10 = tpu.matmul %8, %6, %cst_10 {dimension_numbers = #tpu.dot_dimension_numbers<[1], [0], [0], [1], [0, 0, 1, 1], [], []>} : vector<8x128xf32>, vector<128x128xf32>, vector<8x128xf32> -> vector<8x128xf32>
    %11 = arith.addf %9, %10 : vector<8x128xf32>
    %cst_11 = arith.constant 0.000000e+00 : f32
    %12 = vector.broadcast %cst_11 : f32 to vector<8x128xf32>
    %13 = arith.maximumf %11, %12 : vector<8x128xf32>
    %cst_12 = arith.constant dense<0.000000e+00> : vector<8x128xf32>
    %14 = tpu.matmul %13, %7, %cst_12 {dimension_numbers = #tpu.dot_dimension_numbers<[1], [0], [0], [1], [0, 0, 1, 1], [], []>} : vector<8x128xf32>, vector<128x128xf32>, vector<8x128xf32> -> vector<8x128xf32>
    %c0_13 = arith.constant 0 : index
    %c0_14 = arith.constant 0 : index
    %15 = vector.load %arg5[%c0_13, %c0_14] : memref<64x128xf32, #tpu.memory_space<vmem>>, vector<8x128xf32>
    tpu.vector_store %arg5[%c0_13, %c0_14], %14 {strides = array<i32>} : memref<64x128xf32, #tpu.memory_space<vmem>>, vector<8x128xf32>,
    %16 = vector.extract_strided_slice %5 {offsets = [8, 0], sizes = [8, 128], strides = [1, 1]} : vector<64x128xf32> to vector<8x128xf32>
    %cst_15 = arith.constant dense<0.000000e+00> : vector<8x128xf32>
    %17 = tpu.matmul %13, %6, %cst_15 {dimension_numbers = #tpu.dot_dimension_numbers<[1], [0], [0], [1], [0, 0, 1, 1], [], []>} : vector<8x128xf32>, vector<128x128xf32>, vector<8x128xf32> -> vector<8x128xf32>
    %18 = arith.addf %16, %17 : vector<8x128xf32>
    %cst_16 = arith.constant 0.000000e+00 : f32
    %19 = vector.broadcast %cst_16 : f32 to vector<8x128xf32>
    %20 = arith.maximumf %18, %19 : vector<8x128xf32>
    %cst_17 = arith.constant dense<0.000000e+00> : vector<8x128xf32>
    %21 = tpu.matmul %20, %7, %cst_17 {dimension_numbers = #tpu.dot_dimension_numbers<[1], [0], [0], [1], [0, 0, 1, 1], [], []>} : vector<8x128xf32>, vector<128x128xf32>, vector<8x128xf32> -> vector<8x128xf32>
    %c8 = arith.constant 8 : index
    %c0_18 = arith.constant 0 : index
    %22 = vector.load %arg5[%c8, %c0_18] : memref<64x128xf32, #tpu.memory_space<vmem>>, vector<8x128xf32>
    tpu.vector_store %arg5[%c8, %c0_18], %21 {strides = array<i32>} : memref<64x128xf32, #tpu.memory_space<vmem>>, vector<8x128xf32>,
    %23 = vector.extract_strided_slice %5 {offsets = [16, 0], sizes = [8, 128], strides = [1, 1]} : vector<64x128xf32> to vector<8x128xf32>
    %cst_19 = arith.constant dense<0.000000e+00> : vector<8x128xf32>
    %24 = tpu.matmul %20, %6, %cst_19 {dimension_numbers = #tpu.dot_dimension_numbers<[1], [0], [0], [1], [0, 0, 1, 1], [], []>} : vector<8x128xf32>, vector<128x128xf32>, vector<8x128xf32> -> vector<8x128xf32>
    %25 = arith.addf %23, %24 : vector<8x128xf32>
    %cst_20 = arith.constant 0.000000e+00 : f32
    %26 = vector.broadcast %cst_20 : f32 to vector<8x128xf32>
    %27 = arith.maximumf %25, %26 : vector<8x128xf32>
    %cst_21 = arith.constant dense<0.000000e+00> : vector<8x128xf32>
    %28 = tpu.matmul %27, %7, %cst_21 {dimension_numbers = #tpu.dot_dimension_numbers<[1], [0], [0], [1], [0, 0, 1, 1], [], []>} : vector<8x128xf32>, vector<128x128xf32>, vector<8x128xf32> -> vector<8x128xf32>
    %c16 = arith.constant 16 : index
    %c0_22 = arith.constant 0 : index
    %29 = vector.load %arg5[%c16, %c0_22] : memref<64x128xf32, #tpu.memory_space<vmem>>, vector<8x128xf32>
    tpu.vector_store %arg5[%c16, %c0_22], %28 {strides = array<i32>} : memref<64x128xf32, #tpu.memory_space<vmem>>, vector<8x128xf32>,
    %30 = vector.extract_strided_slice %5 {offsets = [24, 0], sizes = [8, 128], strides = [1, 1]} : vector<64x128xf32> to vector<8x128xf32>
    %cst_23 = arith.constant dense<0.000000e+00> : vector<8x128xf32>
    %31 = tpu.matmul %27, %6, %cst_23 {dimension_numbers = #tpu.dot_dimension_numbers<[1], [0], [0], [1], [0, 0, 1, 1], [], []>} : vector<8x128xf32>, vector<128x128xf32>, vector<8x128xf32> -> vector<8x128xf32>
    %32 = arith.addf %30, %31 : vector<8x128xf32>
    %cst_24 = arith.constant 0.000000e+00 : f32
    %33 = vector.broadcast %cst_24 : f32 to vector<8x128xf32>
    %34 = arith.maximumf %32, %33 : vector<8x128xf32>
    %cst_25 = arith.constant dense<0.000000e+00> : vector<8x128xf32>
    %35 = tpu.matmul %34, %7, %cst_25 {dimension_numbers = #tpu.dot_dimension_numbers<[1], [0], [0], [1], [0, 0, 1, 1], [], []>} : vector<8x128xf32>, vector<128x128xf32>, vector<8x128xf32> -> vector<8x128xf32>
    %c24 = arith.constant 24 : index
    %c0_26 = arith.constant 0 : index
    %36 = vector.load %arg5[%c24, %c0_26] : memref<64x128xf32, #tpu.memory_space<vmem>>, vector<8x128xf32>
    tpu.vector_store %arg5[%c24, %c0_26], %35 {strides = array<i32>} : memref<64x128xf32, #tpu.memory_space<vmem>>, vector<8x128xf32>,
    %37 = vector.extract_strided_slice %5 {offsets = [32, 0], sizes = [8, 128], strides = [1, 1]} : vector<64x128xf32> to vector<8x128xf32>
    %cst_27 = arith.constant dense<0.000000e+00> : vector<8x128xf32>
    %38 = tpu.matmul %34, %6, %cst_27 {dimension_numbers = #tpu.dot_dimension_numbers<[1], [0], [0], [1], [0, 0, 1, 1], [], []>} : vector<8x128xf32>, vector<128x128xf32>, vector<8x128xf32> -> vector<8x128xf32>
    %39 = arith.addf %37, %38 : vector<8x128xf32>
    %cst_28 = arith.constant 0.000000e+00 : f32
    %40 = vector.broadcast %cst_28 : f32 to vector<8x128xf32>
    %41 = arith.maximumf %39, %40 : vector<8x128xf32>
    %cst_29 = arith.constant dense<0.000000e+00> : vector<8x128xf32>
    %42 = tpu.matmul %41, %7, %cst_29 {dimension_numbers = #tpu.dot_dimension_numbers<[1], [0], [0], [1], [0, 0, 1, 1], [], []>} : vector<8x128xf32>, vector<128x128xf32>, vector<8x128xf32> -> vector<8x128xf32>
    %c32 = arith.constant 32 : index
    %c0_30 = arith.constant 0 : index
    %43 = vector.load %arg5[%c32, %c0_30] : memref<64x128xf32, #tpu.memory_space<vmem>>, vector<8x128xf32>
    tpu.vector_store %arg5[%c32, %c0_30], %42 {strides = array<i32>} : memref<64x128xf32, #tpu.memory_space<vmem>>, vector<8x128xf32>,
    %44 = vector.extract_strided_slice %5 {offsets = [40, 0], sizes = [8, 128], strides = [1, 1]} : vector<64x128xf32> to vector<8x128xf32>
    %cst_31 = arith.constant dense<0.000000e+00> : vector<8x128xf32>
    %45 = tpu.matmul %41, %6, %cst_31 {dimension_numbers = #tpu.dot_dimension_numbers<[1], [0], [0], [1], [0, 0, 1, 1], [], []>} : vector<8x128xf32>, vector<128x128xf32>, vector<8x128xf32> -> vector<8x128xf32>
    %46 = arith.addf %44, %45 : vector<8x128xf32>
    %cst_32 = arith.constant 0.000000e+00 : f32
    %47 = vector.broadcast %cst_32 : f32 to vector<8x128xf32>
    %48 = arith.maximumf %46, %47 : vector<8x128xf32>
    %cst_33 = arith.constant dense<0.000000e+00> : vector<8x128xf32>
    %49 = tpu.matmul %48, %7, %cst_33 {dimension_numbers = #tpu.dot_dimension_numbers<[1], [0], [0], [1], [0, 0, 1, 1], [], []>} : vector<8x128xf32>, vector<128x128xf32>, vector<8x128xf32> -> vector<8x128xf32>
    %c40 = arith.constant 40 : index
    %c0_34 = arith.constant 0 : index
    %50 = vector.load %arg5[%c40, %c0_34] : memref<64x128xf32, #tpu.memory_space<vmem>>, vector<8x128xf32>
    tpu.vector_store %arg5[%c40, %c0_34], %49 {strides = array<i32>} : memref<64x128xf32, #tpu.memory_space<vmem>>, vector<8x128xf32>,
    %51 = vector.extract_strided_slice %5 {offsets = [48, 0], sizes = [8, 128], strides = [1, 1]} : vector<64x128xf32> to vector<8x128xf32>
    %cst_35 = arith.constant dense<0.000000e+00> : vector<8x128xf32>
    %52 = tpu.matmul %48, %6, %cst_35 {dimension_numbers = #tpu.dot_dimension_numbers<[1], [0], [0], [1], [0, 0, 1, 1], [], []>} : vector<8x128xf32>, vector<128x128xf32>, vector<8x128xf32> -> vector<8x128xf32>
    %53 = arith.addf %51, %52 : vector<8x128xf32>
    %cst_36 = arith.constant 0.000000e+00 : f32
    %54 = vector.broadcast %cst_36 : f32 to vector<8x128xf32>
    %55 = arith.maximumf %53, %54 : vector<8x128xf32>
    %cst_37 = arith.constant dense<0.000000e+00> : vector<8x128xf32>
    %56 = tpu.matmul %55, %7, %cst_37 {dimension_numbers = #tpu.dot_dimension_numbers<[1], [0], [0], [1], [0, 0, 1, 1], [], []>} : vector<8x128xf32>, vector<128x128xf32>, vector<8x128xf32> -> vector<8x128xf32>
    %c48 = arith.constant 48 : index
    %c0_38 = arith.constant 0 : index
    %57 = vector.load %arg5[%c48, %c0_38] : memref<64x128xf32, #tpu.memory_space<vmem>>, vector<8x128xf32>
    tpu.vector_store %arg5[%c48, %c0_38], %56 {strides = array<i32>} : memref<64x128xf32, #tpu.memory_space<vmem>>, vector<8x128xf32>,
    %58 = vector.extract_strided_slice %5 {offsets = [56, 0], sizes = [8, 128], strides = [1, 1]} : vector<64x128xf32> to vector<8x128xf32>
    %cst_39 = arith.constant dense<0.000000e+00> : vector<8x128xf32>
    %59 = tpu.matmul %55, %6, %cst_39 {dimension_numbers = #tpu.dot_dimension_numbers<[1], [0], [0], [1], [0, 0, 1, 1], [], []>} : vector<8x128xf32>, vector<128x128xf32>, vector<8x128xf32> -> vector<8x128xf32>
    %60 = arith.addf %58, %59 : vector<8x128xf32>
    %cst_40 = arith.constant 0.000000e+00 : f32
    %61 = vector.broadcast %cst_40 : f32 to vector<8x128xf32>
    %62 = arith.maximumf %60, %61 : vector<8x128xf32>
    %cst_41 = arith.constant dense<0.000000e+00> : vector<8x128xf32>
    %63 = tpu.matmul %62, %7, %cst_41 {dimension_numbers = #tpu.dot_dimension_numbers<[1], [0], [0], [1], [0, 0, 1, 1], [], []>} : vector<8x128xf32>, vector<128x128xf32>, vector<8x128xf32> -> vector<8x128xf32>
    %c56 = arith.constant 56 : index
    %c0_42 = arith.constant 0 : index
    %64 = vector.load %arg5[%c56, %c0_42] : memref<64x128xf32, #tpu.memory_space<vmem>>, vector<8x128xf32>
    tpu.vector_store %arg5[%c56, %c0_42], %63 {strides = array<i32>} : memref<64x128xf32, #tpu.memory_space<vmem>>, vector<8x128xf32>,
    return
  }
}

</mosaic_0001>

<bundles_post_ra>
// kernel: simple_rnn_forward.1
= control target key start
LH: loop header
LB: loop body
LE: loop exit
PB: predicated region body
PF: predicated region fallthrough
CT: control target
= control target key end

     0   :  { %10 = vsyncpa [#allocation3], 0  ;;  %s1027_s0 = inlined_call_operand.vmem [shape: f32[64,128], index: 0, kind: input, shape index: {}]   ;;  %s1028_s1 = inlined_call_operand.hbm [shape: f32[128,128], index: 1, kind: input, shape index: {}]   ;;  %s1029_s2 = inlined_call_operand.hbm [shape: f32[128,128], index: 2, kind: input, shape index: {}]   ;;  %s1030_s3 = inlined_call_operand.vmem [shape: f32[1,128], index: 3, kind: input, shape index: {}]   ;;  %s1031_s4 = inlined_call_operand.hbm [shape: f32[128,128], index: 4, kind: input, shape index: {}]   ;;  %s1032_s5 = inlined_call_operand.vmem [shape: f32[64,128], index: 5, kind: output, shape index: {}]  }
   0x1   :  { %11 = vsyncpa [#allocation5], 0  ;;  %s31_s20 = sshll.u32 %s1029_s2, 4  ;;  %s601_s21 = smov [#allocation4]   ;;  %s32_s20 = int_to_ptr.hbm [resolvable:$true] %s31_s20 }
   0x2   :  { %s33_s22 = sshll.u32 %s601_s21, 4  ;;  %s18_s25 = sshll.u32 %s1028_s1, 4  ;;  %s34_s22 = int_to_ptr.vmem [resolvable:$true] %s33_s22  ;;  %s19_s25 = int_to_ptr.hbm [resolvable:$true] %s18_s25 }
   0x3   :  { %s602_s26 = smov 128   ;;  %s603_s27 = smov 8  }
   0x4   :  { %39 = dma.hbm_to_vmem [thread:$0]  %s32_s20, 2048, %s34_s22, [#allocation5], %s602_s26, %s602_s26, %s603_s27  }
   0x5   :  { %s604_s28 = smov [#allocation2]   ;;  %s46_s7 = sshll.u32 %s1031_s4, 4  ;;  %s47_s7 = int_to_ptr.hbm [resolvable:$true] %s46_s7 }
   0x6   :  { %s20_s29 = sshll.u32 %s604_s28, 4  ;;  %s605_s2 = smov [#allocation6]   ;;  %s21_s29 = int_to_ptr.vmem [resolvable:$true] %s20_s29 }
   0x7   :  { %26 = dma.hbm_to_vmem [thread:$0]  %s19_s25, 2048, %s21_s29, [#allocation3], %s602_s26, %s602_s26, %s603_s27  }
   0x8   :  { %s48_s8 = sshll.u32 %s605_s2, 4  ;;  %s49_s8 = int_to_ptr.vmem [resolvable:$true] %s48_s8 }
   0x9   :  { %54 = dma.hbm_to_vmem [thread:$0]  %s47_s7, 2048, %s49_s8, [#allocation5], %s602_s26, %s602_s26, %s603_s27  }
   0xa   :  { %597 = dma.done.wait [#allocation3], 2048  }
   0xb   :  { %598 = vsyncadd [#allocation3], 4294965248 }
   0xc   :  { %599 = dma.done.wait [#allocation5], 4096  }
   0xd   :  { %600 = vsyncadd [#allocation5], 4294963200  ;;  %v90_v0 = vld [vmem:[#allocation2 + $0x78] sm:$0xff]  ;;  %v89_v1 = vld [vmem:[#allocation2 + $0x70] sm:$0xff]  ;;  %v606_v44 = vmov 0.0  }
   0xe   :  { %v646_v2 = vld [vmem:[#allocation4 + $0x78] sm:$0xff]  ;;  %95 = vmatpush.msra.mxu0 %v90_v0  ;;  %v649_v3 = vld [vmem:[#allocation4 + $0x70] sm:$0xff]  ;;  %v88_v4 = vld [vmem:[#allocation2 + $0x68] sm:$0xff] }
   0xf   :  { %168 = vmatpush.msra.mxu1 %v646_v2  ;;  %v651_v5 = vld [vmem:[#allocation4 + $0x68] sm:$0xff]  ;;  %211 = vmatpush.msra.mxu3 %v646_v2  ;;  %v87_v6 = vld [vmem:[#allocation2 + $0x60] sm:$0xff]  ;;  %v86_v8 = vld [vmem:[#allocation2 + $0x58] sm:$0xff] }
  0x10   :  { %96 = vmatpush.msra.mxu0 %v89_v1  ;;  %v655_v7 = vld [vmem:[#allocation4 + $0x60] sm:$0xff]  ;;  %v659_v9 = vld [vmem:[#allocation4 + $0x58] sm:$0xff]  ;;  %v85_v10 = vld [vmem:[#allocation2 + $0x50] sm:$0xff] }
  0x11   :  { %169 = vmatpush.msra.mxu1 %v649_v3  ;;  %212 = vmatpush.msra.mxu3 %v649_v3  ;;  %v663_v11 = vld [vmem:[#allocation4 + $0x50] sm:$0xff]  ;;  %v84_v12 = vld [vmem:[#allocation2 + $0x48] sm:$0xff]  ;;  %v671_v14 = vld [vmem:[#allocation6 + $0x78] sm:$0xff] }
  0x12   :  { %97 = vmatpush.msra.mxu0 %v88_v4  ;;  %v667_v13 = vld [vmem:[#allocation4 + $0x48] sm:$0xff]  ;;  %v673_v15 = vld [vmem:[#allocation6 + $0x70] sm:$0xff]  ;;  %v83_v16 = vld [vmem:[#allocation2 + $0x40] sm:$0xff]  ;;  %190 = vmatpush.msra.mxu2 %v671_v14 }
  0x13   :  { %170 = vmatpush.msra.mxu1 %v651_v5  ;;  %213 = vmatpush.msra.mxu3 %v651_v5  ;;  %v675_v17 = vld [vmem:[#allocation4 + $0x40] sm:$0xff]  ;;  %v680_v18 = vld [vmem:[#allocation6 + $0x68] sm:$0xff]  ;;  %v82_v19 = vld [vmem:[#allocation2 + $0x38] sm:$0xff] }
  0x14   :  { %98 = vmatpush.msra.mxu0 %v87_v6  ;;  %v682_v20 = vld [vmem:[#allocation4 + $0x38] sm:$0xff]  ;;  %191 = vmatpush.msra.mxu2 %v673_v15  ;;  %v687_v21 = vld [vmem:[#allocation6 + $0x60] sm:$0xff]  ;;  %v81_v22 = vld [vmem:[#allocation2 + $0x30] sm:$0xff] }
  0x15   :  { %171 = vmatpush.msra.mxu1 %v655_v7  ;;  %214 = vmatpush.msra.mxu3 %v655_v7  ;;  %v689_v23 = vld [vmem:[#allocation4 + $0x30] sm:$0xff]  ;;  %v694_v24 = vld [vmem:[#allocation6 + $0x58] sm:$0xff]  ;;  %v80_v25 = vld [vmem:[#allocation2 + $0x28] sm:$0xff] }
  0x16   :  { %99 = vmatpush.msra.mxu0 %v86_v8  ;;  %192 = vmatpush.msra.mxu2 %v680_v18  ;;  %v696_v26 = vld [vmem:[#allocation4 + $0x28] sm:$0xff]  ;;  %v701_v27 = vld [vmem:[#allocation6 + $0x50] sm:$0xff]  ;;  %v79_v28 = vld [vmem:[#allocation2 + $0x20] sm:$0xff] }
  0x17   :  { %172 = vmatpush.msra.mxu1 %v659_v9  ;;  %215 = vmatpush.msra.mxu3 %v659_v9  ;;  %v703_v29 = vld [vmem:[#allocation4 + $0x20] sm:$0xff]  ;;  %v708_v30 = vld [vmem:[#allocation6 + $0x48] sm:$0xff]  ;;  %v78_v31 = vld [vmem:[#allocation2 + $0x18] sm:$0xff] }
  0x18   :  { %100 = vmatpush.msra.mxu0 %v85_v10  ;;  %193 = vmatpush.msra.mxu2 %v687_v21  ;;  %v710_v32 = vld [vmem:[#allocation4 + $0x18] sm:$0xff]  ;;  %v715_v33 = vld [vmem:[#allocation6 + $0x40] sm:$0xff]  ;;  %v77_v34 = vld [vmem:[#allocation2 + $0x10] sm:$0xff] }
  0x19   :  { %173 = vmatpush.msra.mxu1 %v663_v11  ;;  %216 = vmatpush.msra.mxu3 %v663_v11  ;;  %v717_v35 = vld [vmem:[#allocation4 + $0x10] sm:$0xff]  ;;  %v722_v36 = vld [vmem:[#allocation6 + $0x38] sm:$0xff]  ;;  %v76_v37 = vld [vmem:[#allocation2 + $0x8] sm:$0xff] }
  0x1a   :  { %101 = vmatpush.msra.mxu0 %v84_v12  ;;  %194 = vmatpush.msra.mxu2 %v694_v24  ;;  %v724_v38 = vld [vmem:[#allocation4 + $0x8] sm:$0xff]  ;;  %v729_v39 = vld [vmem:[#allocation6 + $0x30] sm:$0xff]  ;;  %v75_v40 = vld [vmem:[#allocation2] sm:$0xff] }
  0x1b   :  { %174 = vmatpush.msra.mxu1 %v667_v13  ;;  %217 = vmatpush.msra.mxu3 %v667_v13  ;;  %v731_v41 = vld [vmem:[#allocation4] sm:$0xff]  ;;  %v740_v43 = vld [vmem:[#allocation6 + $0x28] sm:$0xff]  ;;  %v805_v46 = vld [vmem:[#allocation6 + $0x18] sm:$0xff] }
  0x1c   :  { %102 = vmatpush.msra.mxu0 %v83_v16  ;;  %195 = vmatpush.msra.mxu2 %v701_v27  ;;  %v67_v42 = vld [vmem:[%s1027_s0] sm:$0xff]  ;;  %v809_v47 = vld [vmem:[#allocation6 + $0x10] sm:$0xff]  ;;  %v814_v48 = vld [vmem:[#allocation6 + $0x8] sm:$0xff] }
  0x1d   :  { %175 = vmatpush.msra.mxu1 %v675_v17  ;;  %218 = vmatpush.msra.mxu3 %v675_v17  ;;  %v744_v45 = vld [vmem:[#allocation6 + $0x20] sm:$0xff]  ;;  %v68_v50 = vld [vmem:[%s1027_s0 + $0x8] sm:$0xff]  ;;  %v69_v57 = vld [vmem:[%s1027_s0 + $0x10] sm:$0xff] }
  0x1e   :  { %103 = vmatpush.msra.mxu0 %v82_v19  ;;  %196 = vmatpush.msra.mxu2 %v708_v30  ;;  %v819_v49 = vld [vmem:[#allocation6] sm:$0xff]  ;;  %v70_v58 = vld [vmem:[%s1027_s0 + $0x18] sm:$0xff]  ;;  %v72_v61 = vld [vmem:[%s1027_s0 + $0x28] sm:$0xff] }
  0x1f   :  { %176 = vmatpush.msra.mxu1 %v682_v20  ;;  %219 = vmatpush.msra.mxu3 %v682_v20  ;;  %v853_v51 = vld [vmem:[%s1030_s3] ss:$0 sm:$0xff]  ;;  %v73_v6 = vld [vmem:[%s1027_s0 + $0x30] sm:$0xff]  ;;  %v74_v8 = vld [vmem:[%s1027_s0 + $0x38] sm:$0xff] }
  0x20   :  { %104 = vmatpush.msra.mxu0 %v81_v22  ;;  %197 = vmatpush.msra.mxu2 %v715_v33  ;;  %v71_v59 = vld [vmem:[%s1027_s0 + $0x20] sm:$0xff] }
  0x21   :  { %177 = vmatpush.msra.mxu1 %v689_v23  ;;  %220 = vmatpush.msra.mxu3 %v689_v23 }
  0x22   :  { %105 = vmatpush.msra.mxu0 %v80_v25  ;;  %198 = vmatpush.msra.mxu2 %v722_v36 }
  0x23   :  { %178 = vmatpush.msra.mxu1 %v696_v26  ;;  %221 = vmatpush.msra.mxu3 %v696_v26 }
  0x24   :  { %106 = vmatpush.msra.mxu0 %v79_v28  ;;  %199 = vmatpush.msra.mxu2 %v729_v39 }
  0x25   :  { %179 = vmatpush.msra.mxu1 %v703_v29  ;;  %222 = vmatpush.msra.mxu3 %v703_v29 }
  0x26   :  { %107 = vmatpush.msra.mxu0 %v78_v31  ;;  %200 = vmatpush.msra.mxu2 %v740_v43 }
  0x27   :  { %180 = vmatpush.msra.mxu1 %v710_v32  ;;  %223 = vmatpush.msra.mxu3 %v710_v32 }
  0x28   :  { %108 = vmatpush.msra.mxu0 %v77_v34  ;;  %201 = vmatpush.msra.mxu2 %v744_v45 }
  0x29   :  { %181 = vmatpush.msra.mxu1 %v717_v35  ;;  %224 = vmatpush.msra.mxu3 %v717_v35 }
  0x2a   :  { %109 = vmatpush.msra.mxu0 %v76_v37  ;;  %202 = vmatpush.msra.mxu2 %v805_v46 }
  0x2b   :  { %182 = vmatpush.msra.mxu1 %v724_v38  ;;  %225 = vmatpush.msra.mxu3 %v724_v38 }
  0x2c   :  { %110 = vmatpush.msra.mxu0 %v75_v40  ;;  %203 = vmatpush.msra.mxu2 %v809_v47 }
  0x2d   :  { %183 = vmatpush.msra.mxu1 %v731_v41  ;;  %111 = vmatmul.f32.vlgmr.msra.gmra.mxu0 %v67_v42 }
  0x2e   :  { %184 = vmatmul.f32.vlgmr.msra.gmra.mxu1 %v606_v44  ;;  %226 = vmatpush.msra.mxu3 %v731_v41 }
  0x2f   :  { %233 = vmatpush.msrb.mxu1 %v671_v14  ;;  %297 = vmatpush.msrb.mxu0 %v646_v2 }
  0x30   :  { %276 = vmatpush.msrb.mxu3 %v671_v14  ;;  %204 = vmatpush.msra.mxu2 %v814_v48 }
  0x31   :  { %234 = vmatpush.msrb.mxu1 %v673_v15  ;;  %298 = vmatpush.msrb.mxu0 %v649_v3 }
  0x32   :  { %277 = vmatpush.msrb.mxu3 %v673_v15  ;;  %205 = vmatpush.msra.mxu2 %v819_v49 }
  0x33   :  { %235 = vmatpush.msrb.mxu1 %v680_v18  ;;  %299 = vmatpush.msrb.mxu0 %v651_v5 }
  0x34   :  { %278 = vmatpush.msrb.mxu3 %v680_v18  ;;  %254 = vmatpush.msrb.mxu2 %v646_v2 }
  0x35   :  { %236 = vmatpush.msrb.mxu1 %v687_v21  ;;  %300 = vmatpush.msrb.mxu0 %v655_v7 }
  0x36   :  { %279 = vmatpush.msrb.mxu3 %v687_v21  ;;  %114 = vmatmul.f32.gmra.mxu0 %v68_v50 }
  0x37   :  { %237 = vmatpush.msrb.mxu1 %v694_v24  ;;  %301 = vmatpush.msrb.mxu0 %v659_v9 }
  0x38   :  { %280 = vmatpush.msrb.mxu3 %v694_v24  ;;  %255 = vmatpush.msrb.mxu2 %v649_v3 }
  0x39   :  { %238 = vmatpush.msrb.mxu1 %v701_v27  ;;  %302 = vmatpush.msrb.mxu0 %v663_v11 }
  0x3a   :  { %281 = vmatpush.msrb.mxu3 %v701_v27  ;;  %256 = vmatpush.msrb.mxu2 %v651_v5 }
  0x3b   :  { %239 = vmatpush.msrb.mxu1 %v708_v30  ;;  %303 = vmatpush.msrb.mxu0 %v667_v13 }
  0x3c   :  { %282 = vmatpush.msrb.mxu3 %v708_v30  ;;  %257 = vmatpush.msrb.mxu2 %v655_v7 }
  0x3d   :  { %240 = vmatpush.msrb.mxu1 %v715_v33  ;;  %304 = vmatpush.msrb.mxu0 %v675_v17 }
  0x3e   :  { %283 = vmatpush.msrb.mxu3 %v715_v33  ;;  %258 = vmatpush.msrb.mxu2 %v659_v9 }
  0x3f   :  { %241 = vmatpush.msrb.mxu1 %v722_v36  ;;  %305 = vmatpush.msrb.mxu0 %v682_v20 }
  0x40   :  { %284 = vmatpush.msrb.mxu3 %v722_v36  ;;  %259 = vmatpush.msrb.mxu2 %v663_v11 }
  0x41   :  { %242 = vmatpush.msrb.mxu1 %v729_v39  ;;  %306 = vmatpush.msrb.mxu0 %v689_v23 }
  0x42   :  { %285 = vmatpush.msrb.mxu3 %v729_v39  ;;  %260 = vmatpush.msrb.mxu2 %v667_v13 }
  0x43   :  { %243 = vmatpush.msrb.mxu1 %v740_v43  ;;  %307 = vmatpush.msrb.mxu0 %v696_v26 }
  0x44   :  { %286 = vmatpush.msrb.mxu3 %v740_v43  ;;  %261 = vmatpush.msrb.mxu2 %v675_v17 }
  0x45   :  { %244 = vmatpush.msrb.mxu1 %v744_v45  ;;  %308 = vmatpush.msrb.mxu0 %v703_v29 }
  0x46   :  { %287 = vmatpush.msrb.mxu3 %v744_v45  ;;  %262 = vmatpush.msrb.mxu2 %v682_v20 }
  0x47   :  { %309 = vmatpush.msrb.mxu0 %v710_v32  ;;  %245 = vmatpush.msrb.mxu1 %v805_v46 }
  0x48   :  { %288 = vmatpush.msrb.mxu3 %v805_v46  ;;  %263 = vmatpush.msrb.mxu2 %v689_v23 }
  0x49   :  { %310 = vmatpush.msrb.mxu0 %v717_v35  ;;  %246 = vmatpush.msrb.mxu1 %v809_v47 }
  0x4a   :  { %289 = vmatpush.msrb.mxu3 %v809_v47  ;;  %264 = vmatpush.msrb.mxu2 %v696_v26 }
  0x4b   :  { %311 = vmatpush.msrb.mxu0 %v724_v38  ;;  %247 = vmatpush.msrb.mxu1 %v814_v48 }
  0x4c   :  { %290 = vmatpush.msrb.mxu3 %v814_v48  ;;  %265 = vmatpush.msrb.mxu2 %v703_v29 }
  0x4d   :  { %312 = vmatpush.msrb.mxu0 %v731_v41  ;;  %248 = vmatpush.msrb.mxu1 %v819_v49 }
  0x4e   :  { %291 = vmatpush.msrb.mxu3 %v819_v49  ;;  %266 = vmatpush.msrb.mxu2 %v710_v32 }
  0x4f   :  { %383 = vmatpush.msra.mxu0 %v646_v2  ;;  %319 = vmatpush.msra.mxu1 %v671_v14 }
  0x50   :  { %267 = vmatpush.msrb.mxu2 %v717_v35  ;;  %117 = vmatmul.f32.gmra.mxu0 %v69_v57 }
  0x51   :  { %384 = vmatpush.msra.mxu0 %v649_v3  ;;  %320 = vmatpush.msra.mxu1 %v673_v15 }
  0x52   :  { %268 = vmatpush.msrb.mxu2 %v724_v38 }
  0x53   :  { %385 = vmatpush.msra.mxu0 %v651_v5  ;;  %321 = vmatpush.msra.mxu1 %v680_v18 }
  0x54   :  { %269 = vmatpush.msrb.mxu2 %v731_v41 }
  0x55   :  { %386 = vmatpush.msra.mxu0 %v655_v7  ;;  %322 = vmatpush.msra.mxu1 %v687_v21 }
  0x57   :  { %387 = vmatpush.msra.mxu0 %v659_v9  ;;  %323 = vmatpush.msra.mxu1 %v694_v24 }
  0x58   :  { %120 = vmatmul.f32.gmra.mxu0 %v70_v58 }
  0x59   :  { %388 = vmatpush.msra.mxu0 %v663_v11  ;;  %324 = vmatpush.msra.mxu1 %v701_v27 }
  0x5b   :  { %389 = vmatpush.msra.mxu0 %v667_v13  ;;  %325 = vmatpush.msra.mxu1 %v708_v30 }
  0x5d   :  { %390 = vmatpush.msra.mxu0 %v675_v17  ;;  %326 = vmatpush.msra.mxu1 %v715_v33 }
  0x5f   :  { %391 = vmatpush.msra.mxu0 %v682_v20  ;;  %327 = vmatpush.msra.mxu1 %v722_v36 }
  0x60   :  { %123 = vmatmul.f32.gmra.mxu0 %v71_v59 }
  0x61   :  { %392 = vmatpush.msra.mxu0 %v689_v23  ;;  %328 = vmatpush.msra.mxu1 %v729_v39 }
  0x63   :  { %393 = vmatpush.msra.mxu0 %v696_v26  ;;  %329 = vmatpush.msra.mxu1 %v740_v43 }
  0x65   :  { %394 = vmatpush.msra.mxu0 %v703_v29  ;;  %330 = vmatpush.msra.mxu1 %v744_v45 }
  0x67   :  { %395 = vmatpush.msra.mxu0 %v710_v32  ;;  %331 = vmatpush.msra.mxu1 %v805_v46 }
  0x68   :  { %126 = vmatmul.f32.gmra.mxu0 %v72_v61 }
  0x69   :  { %396 = vmatpush.msra.mxu0 %v717_v35  ;;  %332 = vmatpush.msra.mxu1 %v809_v47 }
  0x6b   :  { %397 = vmatpush.msra.mxu0 %v724_v38  ;;  %333 = vmatpush.msra.mxu1 %v814_v48 }
  0x6d   :  { %398 = vmatpush.msra.mxu0 %v731_v41  ;;  %334 = vmatpush.msra.mxu1 %v819_v49 }
  0x70   :  { %129 = vmatmul.f32.gmra.mxu0 %v73_v6 }
  0x78   :  { %132 = vmatmul.f32.gmra.mxu0 %v74_v8 }
  0xaa   :  { %v112_v52 = vpop.f32.mrf.mxu0 }
  0xab   :  { %v185_v53 = vpop.f32.mrf.mxu1  ;;  %v113_v54 = vadd.f32 %v853_v51, %v112_v52 }
  0xad   :  { %v188_v55 = vadd.f32 %v185_v53, %v113_v54 }
  0xaf   :  { %v189_v56 = vmax.f32 %v188_v55, 0.0 }
  0xb1   :  { %206 = vmatmul.f32.vlgmr.msra.gmra.mxu2 %v189_v56  ;;  %227 = vmatmul.f32.vlgmr.msra.gmra.mxu3 %v189_v56 }
  0xb2   :  { %340 = vmatpush.msra.mxu2 %v646_v2  ;;  %362 = vmatpush.msra.mxu3 %v671_v14 }
  0xb3   :  { %v115_v60 = vpop.f32.mrf.mxu0 }
  0xb4   :  { %341 = vmatpush.msra.mxu2 %v649_v3  ;;  %363 = vmatpush.msra.mxu3 %v673_v15  ;;  %v116_v62 = vadd.f32 %v853_v51, %v115_v60 }
  0xb6   :  { %342 = vmatpush.msra.mxu2 %v651_v5  ;;  %364 = vmatpush.msra.mxu3 %v680_v18 }
  0xb8   :  { %343 = vmatpush.msra.mxu2 %v655_v7  ;;  %365 = vmatpush.msra.mxu3 %v687_v21 }
  0xba   :  { %344 = vmatpush.msra.mxu2 %v659_v9  ;;  %366 = vmatpush.msra.mxu3 %v694_v24 }
  0xbc   :  { %345 = vmatpush.msra.mxu2 %v663_v11  ;;  %367 = vmatpush.msra.mxu3 %v701_v27 }
  0xbe   :  { %346 = vmatpush.msra.mxu2 %v667_v13  ;;  %368 = vmatpush.msra.mxu3 %v708_v30 }
  0xc0   :  { %347 = vmatpush.msra.mxu2 %v675_v17  ;;  %369 = vmatpush.msra.mxu3 %v715_v33 }
  0xc2   :  { %348 = vmatpush.msra.mxu2 %v682_v20  ;;  %370 = vmatpush.msra.mxu3 %v722_v36 }
  0xc4   :  { %349 = vmatpush.msra.mxu2 %v689_v23  ;;  %371 = vmatpush.msra.mxu3 %v729_v39 }
  0xc6   :  { %350 = vmatpush.msra.mxu2 %v696_v26  ;;  %372 = vmatpush.msra.mxu3 %v740_v43 }
  0xc8   :  { %351 = vmatpush.msra.mxu2 %v703_v29  ;;  %373 = vmatpush.msra.mxu3 %v744_v45 }
  0xca   :  { %352 = vmatpush.msra.mxu2 %v710_v32  ;;  %374 = vmatpush.msra.mxu3 %v805_v46 }
  0xcc   :  { %353 = vmatpush.msra.mxu2 %v717_v35  ;;  %375 = vmatpush.msra.mxu3 %v809_v47 }
  0xcd   :  { %v118_v12 = vpop.f32.mrf.mxu0 }
  0xce   :  { %354 = vmatpush.msra.mxu2 %v724_v38  ;;  %376 = vmatpush.msra.mxu3 %v814_v48  ;;  %v119_v16 = vadd.f32 %v853_v51, %v118_v12 }
  0xd0   :  { %355 = vmatpush.msra.mxu2 %v731_v41  ;;  %377 = vmatpush.msra.mxu3 %v819_v49 }
 0x134   :  { %v207_v63 = vpop.f32.mrf.mxu2  ;;  %v228_v0 = vpop.f32.mrf.mxu3 }
 0x135   :  { %210 = vst [vmem:[%s1032_s5] sm:$0xff] %v207_v63  ;;  %v231_v1 = vadd.f32 %v228_v0, %v116_v62 }
 0x137   :  { %v232_v4 = vmax.f32 %v231_v1, 0.0 }
 0x139   :  { %249 = vmatmul.f32.vlgmr.msrb.gmra.mxu1 %v232_v4  ;;  %270 = vmatmul.f32.vlgmr.msrb.gmra.mxu2 %v232_v4 }
 0x13a   :  { %405 = vmatpush.msrb.mxu1 %v671_v14  ;;  %426 = vmatpush.msrb.mxu2 %v646_v2 }
 0x13c   :  { %406 = vmatpush.msrb.mxu1 %v673_v15  ;;  %427 = vmatpush.msrb.mxu2 %v649_v3 }
 0x13e   :  { %407 = vmatpush.msrb.mxu1 %v680_v18  ;;  %428 = vmatpush.msrb.mxu2 %v651_v5 }
 0x140   :  { %408 = vmatpush.msrb.mxu1 %v687_v21  ;;  %429 = vmatpush.msrb.mxu2 %v655_v7 }
 0x142   :  { %409 = vmatpush.msrb.mxu1 %v694_v24  ;;  %430 = vmatpush.msrb.mxu2 %v659_v9 }
 0x144   :  { %410 = vmatpush.msrb.mxu1 %v701_v27  ;;  %431 = vmatpush.msrb.mxu2 %v663_v11 }
 0x146   :  { %411 = vmatpush.msrb.mxu1 %v708_v30  ;;  %432 = vmatpush.msrb.mxu2 %v667_v13 }
 0x148   :  { %412 = vmatpush.msrb.mxu1 %v715_v33  ;;  %433 = vmatpush.msrb.mxu2 %v675_v17 }
 0x14a   :  { %413 = vmatpush.msrb.mxu1 %v722_v36  ;;  %434 = vmatpush.msrb.mxu2 %v682_v20 }
 0x14c   :  { %414 = vmatpush.msrb.mxu1 %v729_v39  ;;  %435 = vmatpush.msrb.mxu2 %v689_v23 }
 0x14e   :  { %415 = vmatpush.msrb.mxu1 %v740_v43  ;;  %436 = vmatpush.msrb.mxu2 %v696_v26 }
 0x150   :  { %416 = vmatpush.msrb.mxu1 %v744_v45  ;;  %437 = vmatpush.msrb.mxu2 %v703_v29 }
 0x152   :  { %417 = vmatpush.msrb.mxu1 %v805_v46  ;;  %438 = vmatpush.msrb.mxu2 %v710_v32 }
 0x154   :  { %418 = vmatpush.msrb.mxu1 %v809_v47  ;;  %439 = vmatpush.msrb.mxu2 %v717_v35 }
 0x156   :  { %419 = vmatpush.msrb.mxu1 %v814_v48  ;;  %440 = vmatpush.msrb.mxu2 %v724_v38 }
 0x158   :  { %420 = vmatpush.msrb.mxu1 %v819_v49  ;;  %441 = vmatpush.msrb.mxu2 %v731_v41 }
 0x1b6   :  { %v250_v10 = vpop.f32.mrf.mxu1 }
 0x1b7   :  { %253 = vst [vmem:[%s1032_s5 + $0x8] sm:$0xff] %v250_v10 }
 0x1bc   :  { %v271_v19 = vpop.f32.mrf.mxu2 }
 0x1bd   :  { %v274_v22 = vadd.f32 %v271_v19, %v119_v16 }
 0x1bf   :  { %v275_v25 = vmax.f32 %v274_v22, 0.0 }
 0x1c1   :  { %292 = vmatmul.f32.vlgmr.msrb.gmra.mxu3 %v275_v25  ;;  %313 = vmatmul.f32.vlgmr.msrb.gmra.mxu0 %v275_v25 }
 0x1c2   :  { %448 = vmatpush.msrb.mxu3 %v671_v14  ;;  %469 = vmatpush.msrb.mxu0 %v646_v2  ;;  %v121_v2 = vpop.f32.mrf.mxu0 }
 0x1c4   :  { %449 = vmatpush.msrb.mxu3 %v673_v15  ;;  %470 = vmatpush.msrb.mxu0 %v649_v3 }
 0x1c6   :  { %450 = vmatpush.msrb.mxu3 %v680_v18  ;;  %471 = vmatpush.msrb.mxu0 %v651_v5 }
 0x1c8   :  { %451 = vmatpush.msrb.mxu3 %v687_v21  ;;  %472 = vmatpush.msrb.mxu0 %v655_v7 }
 0x1ca   :  { %452 = vmatpush.msrb.mxu3 %v694_v24  ;;  %473 = vmatpush.msrb.mxu0 %v659_v9  ;;  %v124_v3 = vpop.f32.mrf.mxu0 }
 0x1cc   :  { %453 = vmatpush.msrb.mxu3 %v701_v27  ;;  %474 = vmatpush.msrb.mxu0 %v663_v11  ;;  %v122_v11 = vadd.f32 %v853_v51, %v121_v2 }
 0x1ce   :  { %454 = vmatpush.msrb.mxu3 %v708_v30  ;;  %475 = vmatpush.msrb.mxu0 %v667_v13 }
 0x1d0   :  { %455 = vmatpush.msrb.mxu3 %v715_v33  ;;  %476 = vmatpush.msrb.mxu0 %v675_v17 }
 0x1d2   :  { %456 = vmatpush.msrb.mxu3 %v722_v36  ;;  %477 = vmatpush.msrb.mxu0 %v682_v20  ;;  %v127_v5 = vpop.f32.mrf.mxu0 }
 0x1d4   :  { %457 = vmatpush.msrb.mxu3 %v729_v39  ;;  %478 = vmatpush.msrb.mxu0 %v689_v23 }
 0x1d6   :  { %458 = vmatpush.msrb.mxu3 %v740_v43  ;;  %479 = vmatpush.msrb.mxu0 %v696_v26  ;;  %v128_v26 = vadd.f32 %v853_v51, %v127_v5 }
 0x1d8   :  { %459 = vmatpush.msrb.mxu3 %v744_v45  ;;  %480 = vmatpush.msrb.mxu0 %v703_v29 }
 0x1da   :  { %460 = vmatpush.msrb.mxu3 %v805_v46  ;;  %481 = vmatpush.msrb.mxu0 %v710_v32  ;;  %v130_v7 = vpop.f32.mrf.mxu0 }
 0x1db   :  { %v131_v32 = vadd.f32 %v853_v51, %v130_v7 }
 0x1dc   :  { %461 = vmatpush.msrb.mxu3 %v809_v47  ;;  %482 = vmatpush.msrb.mxu0 %v717_v35 }
 0x1de   :  { %462 = vmatpush.msrb.mxu3 %v814_v48  ;;  %483 = vmatpush.msrb.mxu0 %v724_v38 }
 0x1e0   :  { %463 = vmatpush.msrb.mxu3 %v819_v49  ;;  %484 = vmatpush.msrb.mxu0 %v731_v41 }
 0x1e2   :  { %v133_v9 = vpop.f32.mrf.mxu0 }
 0x23e   :  { %v314_v13 = vpop.f32.mrf.mxu0 }
 0x23f   :  { %v317_v17 = vadd.f32 %v314_v13, %v122_v11 }
 0x241   :  { %v318_v20 = vmax.f32 %v317_v17, 0.0 }
 0x243   :  { %335 = vmatmul.f32.vlgmr.msra.gmra.mxu1 %v318_v20  ;;  %356 = vmatmul.f32.vlgmr.msra.gmra.mxu2 %v318_v20 }
 0x244   :  { %v293_v23 = vpop.f32.mrf.mxu3  ;;  %491 = vmatpush.msra.mxu1 %v671_v14 }
 0x245   :  { %296 = vst [vmem:[%s1032_s5 + $0x10] sm:$0xff] %v293_v23 }
 0x246   :  { %492 = vmatpush.msra.mxu1 %v673_v15  ;;  %v125_v15 = vadd.f32 %v853_v51, %v124_v3 }
 0x248   :  { %493 = vmatpush.msra.mxu1 %v680_v18 }
 0x24a   :  { %494 = vmatpush.msra.mxu1 %v687_v21 }
 0x24c   :  { %495 = vmatpush.msra.mxu1 %v694_v24 }
 0x24e   :  { %496 = vmatpush.msra.mxu1 %v701_v27 }
 0x250   :  { %497 = vmatpush.msra.mxu1 %v708_v30 }
 0x252   :  { %498 = vmatpush.msra.mxu1 %v715_v33 }
 0x254   :  { %499 = vmatpush.msra.mxu1 %v722_v36  ;;  %v134_v36 = vadd.f32 %v853_v51, %v133_v9 }
 0x256   :  { %500 = vmatpush.msra.mxu1 %v729_v39 }
 0x258   :  { %501 = vmatpush.msra.mxu1 %v740_v43 }
 0x25a   :  { %502 = vmatpush.msra.mxu1 %v744_v45 }
 0x25c   :  { %503 = vmatpush.msra.mxu1 %v805_v46 }
 0x25e   :  { %504 = vmatpush.msra.mxu1 %v809_v47 }
 0x260   :  { %505 = vmatpush.msra.mxu1 %v814_v48 }
 0x262   :  { %506 = vmatpush.msra.mxu1 %v819_v49 }
 0x2c0   :  { %v336_v14 = vpop.f32.mrf.mxu1 }
 0x2c1   :  { %339 = vst [vmem:[%s1032_s5 + $0x18] sm:$0xff] %v336_v14 }
 0x2c6   :  { %v357_v18 = vpop.f32.mrf.mxu2 }
 0x2c7   :  { %v360_v21 = vadd.f32 %v357_v18, %v125_v15 }
 0x2c9   :  { %v361_v24 = vmax.f32 %v360_v21, 0.0 }
 0x2cb   :  { %378 = vmatmul.f32.vlgmr.msra.gmra.mxu3 %v361_v24  ;;  %399 = vmatmul.f32.vlgmr.msra.gmra.mxu0 %v361_v24 }
 0x348   :  { %v400_v27 = vpop.f32.mrf.mxu0 }
 0x349   :  { %v403_v28 = vadd.f32 %v400_v27, %v128_v26 }
 0x34b   :  { %v404_v29 = vmax.f32 %v403_v28, 0.0 }
 0x34d   :  { %421 = vmatmul.f32.vlgmr.msrb.gmra.mxu1 %v404_v29  ;;  %442 = vmatmul.f32.vlgmr.msrb.gmra.mxu2 %v404_v29 }
 0x34e   :  { %v379_v30 = vpop.f32.mrf.mxu3 }
 0x34f   :  { %382 = vst [vmem:[%s1032_s5 + $0x20] sm:$0xff] %v379_v30 }
 0x3ca   :  { %v422_v31 = vpop.f32.mrf.mxu1 }
 0x3cb   :  { %425 = vst [vmem:[%s1032_s5 + $0x28] sm:$0xff] %v422_v31 }
 0x3d0   :  { %v443_v33 = vpop.f32.mrf.mxu2 }
 0x3d1   :  { %v446_v34 = vadd.f32 %v443_v33, %v131_v32 }
 0x3d3   :  { %v447_v35 = vmax.f32 %v446_v34, 0.0 }
 0x3d5   :  { %464 = vmatmul.f32.vlgmr.msrb.gmra.mxu3 %v447_v35  ;;  %485 = vmatmul.f32.vlgmr.msrb.gmra.mxu0 %v447_v35 }
 0x452   :  { %v486_v37 = vpop.f32.mrf.mxu0 }
 0x453   :  { %v489_v38 = vadd.f32 %v486_v37, %v134_v36 }
 0x455   :  { %v490_v39 = vmax.f32 %v489_v38, 0.0 }
 0x457   :  { %507 = vmatmul.f32.vlgmr.msra.gmra.mxu1 %v490_v39 }
 0x458   :  { %v465_v40 = vpop.f32.mrf.mxu3 }
 0x459   :  { %468 = vst [vmem:[%s1032_s5 + $0x30] sm:$0xff] %v465_v40 }
 0x4d4   :  { %v508_v41 = vpop.f32.mrf.mxu1 }
 0x4d5   :  { %511 = vst [vmem:[%s1032_s5 + $0x38] sm:$0xff] %v508_v41 }
 0x4d6   :  { %516 = vsyncpa [#allocation3], 1 }
 0x4d7   :  { %517 = vsyncpa [#allocation5], 1 }

</bundles_post_ra>
